<compile_context>
chip_gen: v5e
topology: v5e:2x2
jax: 0.10.0
libtpu: 0.0.40
codegen_flags: <defaults>
</compile_context>

<pallas_src>
import functools

import jax
import jax.numpy as jnp
from jax.experimental import pallas as pl
from jax.experimental.pallas import tpu as pltpu

_LANE = 128


def _round_up(n, m):
    return ((n + m - 1) // m) * m


def _mlp_kernel(x_ref, w1_ref, w2_ref, w3_ref, w4_ref, b123_ref, b4_ref,
                out_ref, *, apply_sigmoid, compute_dtype):
    """One batch tile of the fused 4-layer MLP. Everything lives in VMEM."""
    b123 = b123_ref[...]                                   # (3, hidden) f32

    def hidden_layer(h, w_ref, b_row):
        acc = jnp.dot(h, w_ref[...], preferred_element_type=jnp.float32) + b_row
        # bf16 path: tanh runs on bf16 vregs (bf16 VPU/EUP on v6e/v7x) -> half
        # the EUP/VPU issue count. f32 path is unchanged (use on v5e).
        return jnp.tanh(acc.astype(compute_dtype))

    h = hidden_layer(x_ref[...], w1_ref, b123[0:1, :])
    h = hidden_layer(h, w2_ref, b123[1:2, :])
    h = hidden_layer(h, w3_ref, b123[2:3, :])
    logit = (jnp.dot(h, w4_ref[...], preferred_element_type=jnp.float32)
             + b4_ref[...])                                # (TB, num_classes) f32
    out_ref[...] = jax.nn.sigmoid(logit) if apply_sigmoid else logit


@functools.partial(
    jax.jit, static_argnames=("return_logit", "block_batch", "compute_dtype"))
def neural_net_forward(x, params, return_logit=False, block_batch=1024,
                       compute_dtype=jnp.float32):
    """Forward pass of NeuralNet. x: [B, input_size] float32.

    block_batch: rows per grid step (rounded to the dtype sublane granule;
                 sweep 512-2048 for big B).
    compute_dtype: jnp.float32 (default) or jnp.bfloat16 (v6e/v7x; also fine on
                   v5e for the matmul/DMA path). MXU accumulation stays f32.
    """
    w1, b1, w2, b2, w3, b3, w4, b4 = params
    B, in_dim = x.shape
    hidden = w1.shape[1]
    num_classes = w4.shape[1]

    # ---- batch tiling: amortize launch overhead, pipeline the x/out DMA ----
    # sublane granule: 8 rows for f32, 16 for sub-32-bit (bf16) packing.
    granule = 16 if jnp.dtype(compute_dtype).itemsize == 2 else 8
    TB = _round_up(min(block_batch, _round_up(B, granule)), granule)
    Bp = _round_up(B, TB)
    # Prefer >= 2 grid steps so the "parallel" axis can shard batch tiles
    # across v7x's two TensorCores (no-op for tiny batches).
    if Bp // TB == 1 and Bp >= 2 * granule:
        TB = _round_up((Bp + 1) // 2, granule)
        Bp = _round_up(B, TB)
    if Bp != B:
        # TODO(synk): handle the ragged last tile in-kernel (row mask) to avoid
        # this extra HBM pass over x when B is not tile-aligned.
        x = jnp.pad(x, ((0, Bp - B), (0, 0)))

    # ---- pack the three hidden-layer biases into one operand ---------------
    b123 = jnp.concatenate([b1, b2, b3], axis=0)           # (3, hidden) f32

    # ---- compute-dtype casts (no-ops when dtypes already match) ------------
    cast = lambda a: a if a.dtype == compute_dtype else a.astype(compute_dtype)
    xc, w1c, w2c, w3c, w4c = cast(x), cast(w1), cast(w2), cast(w3), cast(w4)

    kernel = functools.partial(_mlp_kernel,
                               apply_sigmoid=not return_logit,
                               compute_dtype=compute_dtype)

    full = lambda shape: pl.BlockSpec(shape, lambda i: (0,) * len(shape))

    # ---- explicit VMEM budget (double-buffered tiles + resident weights) ---
    csz = jnp.dtype(compute_dtype).itemsize
    est = (2 * TB * in_dim * csz                           # x tile (x2 buffers)
           + 2 * TB * max(num_classes, _LANE) * 4          # out tile (x2)
           + 2 * csz * (in_dim * hidden + 2 * hidden * hidden
                        + hidden * num_classes)            # weights (x2)
           + 2 * 4 * (3 * hidden + num_classes)            # biases (x2)
           + 6 * TB * max(hidden, _LANE) * 4)              # live intermediates
    vmem_limit = int(min(60 << 20, max(16 << 20, 2 * est)))

    out = pl.pallas_call(
        kernel,
        out_shape=jax.ShapeDtypeStruct((Bp, num_classes), jnp.float32),
        grid=(Bp // TB,),
        in_specs=[
            pl.BlockSpec((TB, in_dim), lambda i: (i, 0)),  # x: batch-tiled
            full((in_dim, hidden)),                        # w1 (resident)
            full((hidden, hidden)),                        # w2
            full((hidden, hidden)),                        # w3
            full((hidden, num_classes)),                   # w4
            full((3, hidden)),                             # packed b1..b3
            full((1, num_classes)),                        # b4
        ],
        out_specs=pl.BlockSpec((TB, num_classes), lambda i: (i, 0)),
        compiler_params=pltpu.CompilerParams(
            dimension_semantics=("parallel",),
            vmem_limit_bytes=vmem_limit),
    )(xc, w1c, w2c, w3c, w4c, b123, b4)

    return out[:B] if Bp != B else out


def init_params(key, input_size, hidden_size, num_classes):
    """Deterministic init mimicking nn.Linear's U(-1/sqrt(fan_in), 1/sqrt(fan_in)).
    Weights are stored as [fan_in, fan_out] (transposed vs. PyTorch)."""
    dims = [(input_size, hidden_size),
            (hidden_size, hidden_size),
            (hidden_size, hidden_size),
            (hidden_size, num_classes)]
    params = []
    for (fan_in, fan_out) in dims:
        key, kw, kb = jax.random.split(key, 3)
        bound = 1.0 / jnp.sqrt(float(fan_in))
        w = jax.random.uniform(kw, (fan_in, fan_out), jnp.float32, -bound, bound)
        b = jax.random.uniform(kb, (1, fan_out), jnp.float32, -bound, bound)
        params.extend([w, b])
    return tuple(params)


def _reference_forward(x, params, return_logit=False):
    w1, b1, w2, b2, w3, b3, w4, b4 = params
    h = jnp.tanh(x @ w1 + b1)
    h = jnp.tanh(h @ w2 + b2)
    h = jnp.tanh(h @ w3 + b3)
    logit = h @ w4 + b4
    return logit if return_logit else jax.nn.sigmoid(logit)


if __name__ == "__main__":
    input_size, hidden_size, num_classes = 16, 32, 4
    batch = 8

    key = jax.random.PRNGKey(0)
    key_x, key_p, key_xl = jax.random.split(key, 3)
    x = jax.random.normal(key_x, (batch, input_size), jnp.float32)
    params = init_params(key_p, input_size, hidden_size, num_classes)

    # small batch: single grid step, both output variants
    prob = neural_net_forward(x, params, return_logit=False)
    logit = neural_net_forward(x, params, return_logit=True)
    jax.block_until_ready((prob, logit))

    ref_prob = _reference_forward(x, params, return_logit=False)
    ref_logit = _reference_forward(x, params, return_logit=True)
    assert prob.shape == (batch, num_classes)
    assert logit.shape == (batch, num_classes)
    assert jnp.allclose(prob, ref_prob, atol=1e-5, rtol=1e-5)
    assert jnp.allclose(logit, ref_logit, atol=1e-5, rtol=1e-5)

    # larger (non-multiple) batch, default tile: exercises the >=2-step split
    big_b = 1000
    xl = jax.random.normal(key_xl, (big_b, input_size), jnp.float32)
    ref_l = _reference_forward(xl, params, return_logit=False)

    prob_d = neural_net_forward(xl, params, return_logit=False)
    jax.block_until_ready(prob_d)
    assert prob_d.shape == (big_b, num_classes)
    assert jnp.allclose(prob_d, ref_l, atol=1e-5, rtol=1e-5)

    # explicit smaller tile: multi-step parallel grid
    prob_l = neural_net_forward(xl, params, return_logit=False, block_batch=256)
    jax.block_until_ready(prob_l)
    assert prob_l.shape == (big_b, num_classes)
    assert jnp.allclose(prob_l, ref_l, atol=1e-5, rtol=1e-5)

    # bf16 compute path (bf16 activations; f32 MXU accumulation) — v6e/v7x
    prob_bf16 = neural_net_forward(xl, params, return_logit=False,
                                   block_batch=256, compute_dtype=jnp.bfloat16)
    jax.block_until_ready(prob_bf16)
    assert jnp.allclose(prob_bf16, ref_l, atol=1e-1, rtol=1e-1)

    print("KERNEL_OK")
</pallas_src>

<mosaic_0001>
module attributes {stable_mosaic.version = 11 : i64} {
  func.func @_mlp_kernel(%arg0: i32, %arg1: memref<8x16xf32, #tpu.memory_space<vmem>>, %arg2: memref<16x32xf32, #tpu.memory_space<vmem>>, %arg3: memref<32x32xf32, #tpu.memory_space<vmem>>, %arg4: memref<32x32xf32, #tpu.memory_space<vmem>>, %arg5: memref<32x4xf32, #tpu.memory_space<vmem>>, %arg6: memref<3x32xf32, #tpu.memory_space<vmem>>, %arg7: memref<1x4xf32, #tpu.memory_space<vmem>>, %arg8: memref<8x4xf32, #tpu.memory_space<vmem>>) attributes {dimension_semantics = [#tpu.dimension_semantics<parallel>], iteration_bounds = array<i64: 1>, scalar_prefetch = 0 : i64, scratch_operands = 0 : i64, tpu.core_type = #tpu.core_type<tc>, window_params = [{transform_indices = @transform_0, window_bounds = array<i64: 8, 16>}, {pipeline_mode = #tpu.pipeline_mode<synchronous>, transform_indices = @transform_1, window_bounds = array<i64: 16, 32>}, {pipeline_mode = #tpu.pipeline_mode<synchronous>, transform_indices = @transform_2, window_bounds = array<i64: 32, 32>}, {pipeline_mode = #tpu.pipeline_mode<synchronous>, transform_indices = @transform_3, window_bounds = array<i64: 32, 32>}, {pipeline_mode = #tpu.pipeline_mode<synchronous>, transform_indices = @transform_4, window_bounds = array<i64: 32, 4>}, {pipeline_mode = #tpu.pipeline_mode<synchronous>, transform_indices = @transform_5, window_bounds = array<i64: 3, 32>}, {pipeline_mode = #tpu.pipeline_mode<synchronous>, transform_indices = @transform_6, window_bounds = array<i64: 1, 4>}, {transform_indices = @transform_7, window_bounds = array<i64: 8, 4>}]} {
    %c0 = arith.constant 0 : index
    %c0_0 = arith.constant 0 : index
    %0 = vector.load %arg6[%c0, %c0_0] : memref<3x32xf32, #tpu.memory_space<vmem>>, vector<3x32xf32>
    %c0_1 = arith.constant 0 : index
    %c0_2 = arith.constant 0 : index
    %1 = vector.load %arg1[%c0_1, %c0_2] : memref<8x16xf32, #tpu.memory_space<vmem>>, vector<8x16xf32>
    %2 = vector.extract_strided_slice %0 {offsets = [0, 0], sizes = [1, 32], strides = [1, 1]} : vector<3x32xf32> to vector<1x32xf32>
    %c0_3 = arith.constant 0 : index
    %c0_4 = arith.constant 0 : index
    %3 = vector.load %arg2[%c0_3, %c0_4] : memref<16x32xf32, #tpu.memory_space<vmem>>, vector<16x32xf32>
    %cst = arith.constant dense<0.000000e+00> : vector<8x32xf32>
    %4 = tpu.matmul %1, %3, %cst {dimension_numbers = #tpu.dot_dimension_numbers<[1], [0], [0], [1], [0, 0, 1, 1], [], []>} : vector<8x16xf32>, vector<16x32xf32>, vector<8x32xf32> -> vector<8x32xf32>
    %5 = vector.broadcast %2 : vector<1x32xf32> to vector<8x32xf32>
    %6 = arith.addf %4, %5 : vector<8x32xf32>
    %7 = math.tanh %6 : vector<8x32xf32>
    %8 = vector.extract_strided_slice %0 {offsets = [1, 0], sizes = [1, 32], strides = [1, 1]} : vector<3x32xf32> to vector<1x32xf32>
    %c0_5 = arith.constant 0 : index
    %c0_6 = arith.constant 0 : index
    %9 = vector.load %arg3[%c0_5, %c0_6] : memref<32x32xf32, #tpu.memory_space<vmem>>, vector<32x32xf32>
    %cst_7 = arith.constant dense<0.000000e+00> : vector<8x32xf32>
    %10 = tpu.matmul %7, %9, %cst_7 {dimension_numbers = #tpu.dot_dimension_numbers<[1], [0], [0], [1], [0, 0, 1, 1], [], []>} : vector<8x32xf32>, vector<32x32xf32>, vector<8x32xf32> -> vector<8x32xf32>
    %11 = vector.broadcast %8 : vector<1x32xf32> to vector<8x32xf32>
    %12 = arith.addf %10, %11 : vector<8x32xf32>
    %13 = math.tanh %12 : vector<8x32xf32>
    %14 = vector.extract_strided_slice %0 {offsets = [2, 0], sizes = [1, 32], strides = [1, 1]} : vector<3x32xf32> to vector<1x32xf32>
    %c0_8 = arith.constant 0 : index
    %c0_9 = arith.constant 0 : index
    %15 = vector.load %arg4[%c0_8, %c0_9] : memref<32x32xf32, #tpu.memory_space<vmem>>, vector<32x32xf32>
    %cst_10 = arith.constant dense<0.000000e+00> : vector<8x32xf32>
    %16 = tpu.matmul %13, %15, %cst_10 {dimension_numbers = #tpu.dot_dimension_numbers<[1], [0], [0], [1], [0, 0, 1, 1], [], []>} : vector<8x32xf32>, vector<32x32xf32>, vector<8x32xf32> -> vector<8x32xf32>
    %17 = vector.broadcast %14 : vector<1x32xf32> to vector<8x32xf32>
    %18 = arith.addf %16, %17 : vector<8x32xf32>
    %19 = math.tanh %18 : vector<8x32xf32>
    %c0_11 = arith.constant 0 : index
    %c0_12 = arith.constant 0 : index
    %20 = vector.load %arg5[%c0_11, %c0_12] : memref<32x4xf32, #tpu.memory_space<vmem>>, vector<32x4xf32>
    %cst_13 = arith.constant dense<0.000000e+00> : vector<8x4xf32>
    %21 = tpu.matmul %19, %20, %cst_13 {dimension_numbers = #tpu.dot_dimension_numbers<[1], [0], [0], [1], [0, 0, 1, 1], [], []>} : vector<8x32xf32>, vector<32x4xf32>, vector<8x4xf32> -> vector<8x4xf32>
    %c0_14 = arith.constant 0 : index
    %c0_15 = arith.constant 0 : index
    %22 = vector.load %arg7[%c0_14, %c0_15] : memref<1x4xf32, #tpu.memory_space<vmem>>, vector<1x4xf32>
    %23 = vector.broadcast %22 : vector<1x4xf32> to vector<8x4xf32>
    %24 = arith.addf %21, %23 : vector<8x4xf32>
    %25 = arith.negf %24 : vector<8x4xf32>
    %26 = math.exp %25 : vector<8x4xf32>
    %cst_16 = arith.constant 1.000000e+00 : f32
    %27 = vector.broadcast %cst_16 : f32 to vector<8x4xf32>
    %28 = arith.addf %27, %26 : vector<8x4xf32>
    %29 = arith.divf %27, %28 : vector<8x4xf32>
    %c0_17 = arith.constant 0 : index
    %c0_18 = arith.constant 0 : index
    %30 = vector.load %arg8[%c0_17, %c0_18] : memref<8x4xf32, #tpu.memory_space<vmem>>, vector<8x4xf32>
    tpu.vector_store %arg8[%c0_17, %c0_18], %29 {strides = array<i32>} : memref<8x4xf32, #tpu.memory_space<vmem>>, vector<8x4xf32>,
    return
  }
  func.func @transform_0(%arg0: i32) -> (i32, i32) {
    %c0_i32 = arith.constant 0 : i32
    %c0_i32_0 = arith.constant 0 : i32
    return %arg0, %c0_i32 : i32, i32
  }
  func.func @transform_1(%arg0: i32) -> (i32, i32) {
    %c0_i32 = arith.constant 0 : i32
    %c0_i32_0 = arith.constant 0 : i32
    %c0_i32_1 = arith.constant 0 : i32
    return %c0_i32, %c0_i32_0 : i32, i32
  }
  func.func @transform_2(%arg0: i32) -> (i32, i32) {
    %c0_i32 = arith.constant 0 : i32
    %c0_i32_0 = arith.constant 0 : i32
    %c0_i32_1 = arith.constant 0 : i32
    return %c0_i32, %c0_i32_0 : i32, i32
  }
  func.func @transform_3(%arg0: i32) -> (i32, i32) {
    %c0_i32 = arith.constant 0 : i32
    %c0_i32_0 = arith.constant 0 : i32
    %c0_i32_1 = arith.constant 0 : i32
    return %c0_i32, %c0_i32_0 : i32, i32
  }
  func.func @transform_4(%arg0: i32) -> (i32, i32) {
    %c0_i32 = arith.constant 0 : i32
    %c0_i32_0 = arith.constant 0 : i32
    %c0_i32_1 = arith.constant 0 : i32
    return %c0_i32, %c0_i32_0 : i32, i32
  }
  func.func @transform_5(%arg0: i32) -> (i32, i32) {
    %c0_i32 = arith.constant 0 : i32
    %c0_i32_0 = arith.constant 0 : i32
    %c0_i32_1 = arith.constant 0 : i32
    return %c0_i32, %c0_i32_0 : i32, i32
  }
  func.func @transform_6(%arg0: i32) -> (i32, i32) {
    %c0_i32 = arith.constant 0 : i32
    %c0_i32_0 = arith.constant 0 : i32
    %c0_i32_1 = arith.constant 0 : i32
    return %c0_i32, %c0_i32_0 : i32, i32
  }
  func.func @transform_7(%arg0: i32) -> (i32, i32) {
    %c0_i32 = arith.constant 0 : i32
    %c0_i32_0 = arith.constant 0 : i32
    return %arg0, %c0_i32 : i32, i32
  }
}

</mosaic_0001>

<bundles_post_ra>
// kernel: neural_net_forward.1
= control target key start
LH: loop header
LB: loop body
LE: loop exit
PB: predicated region body
PF: predicated region fallthrough
CT: control target
= control target key end

     0   :  { %12 = vsyncpa [#allocation3], 0  ;;  %s405_s0 = inlined_call_operand.hbm [shape: f32[8,16], index: 0, kind: input, shape index: {}]   ;;  %s406_s1 = inlined_call_operand.hbm [shape: f32[16,32], index: 1, kind: input, shape index: {}]   ;;  %s407_s2 = inlined_call_operand.vmem [shape: f32[32,32], index: 2, kind: input, shape index: {}]   ;;  %s408_s3 = inlined_call_operand.hbm [shape: f32[32,32], index: 3, kind: input, shape index: {}]   ;;  %s409_s4 = inlined_call_operand.vmem [shape: f32[32,4], index: 4, kind: input, shape index: {}]   ;;  %s410_s5 = inlined_call_operand.vmem [shape: f32[3,32], index: 5, kind: input, shape index: {}]   ;;  %s411_s6 = inlined_call_operand.vmem [shape: f32[1,4], index: 6, kind: input, shape index: {}]   ;;  %s412_s7 = inlined_call_operand.vmem [shape: f32[8,4], index: 7, kind: output, shape index: {}]  }
   0x1   :  { %13 = vsyncpa [#allocation5], 0  ;;  %s29_s26 = sshll.u32 %s406_s1, 4  ;;  %s315_s27 = smov [#allocation4]   ;;  %s30_s26 = int_to_ptr.hbm [resolvable:$true] %s29_s26 }
   0x2   :  { %s31_s28 = sshll.u32 %s315_s27, 4  ;;  %s19_s8 = sshll.u32 %s405_s0, 4  ;;  %s32_s28 = int_to_ptr.vmem [resolvable:$true] %s31_s28  ;;  %s20_s8 = int_to_ptr.hbm [resolvable:$true] %s19_s8 }
   0x3   :  { %s316_s9 = smov 128   ;;  %s317_s10 = smov 8  }
   0x4   :  { %37 = dma.hbm_to_vmem [thread:$0]  %s30_s26, 256, %s32_s28, [#allocation5], %s316_s9, %s316_s9, %s317_s10  }
   0x5   :  { %s318_s11 = smov [#allocation2]   ;;  %s44_s15 = sshll.u32 %s408_s3, 4  ;;  %s45_s15 = int_to_ptr.hbm [resolvable:$true] %s44_s15 }
   0x6   :  { %s21_s12 = sshll.u32 %s318_s11, 4  ;;  %s319_s1 = smov [#allocation6]   ;;  %s22_s12 = int_to_ptr.vmem [resolvable:$true] %s21_s12 }
   0x7   :  { %24 = dma.hbm_to_vmem [thread:$0]  %s20_s8, 128, %s22_s12, [#allocation3]  }
   0x8   :  { %s46_s16 = sshll.u32 %s319_s1, 4  ;;  %s47_s16 = int_to_ptr.vmem [resolvable:$true] %s46_s16 }
   0x9   :  { %52 = dma.hbm_to_vmem [thread:$0]  %s45_s15, 512, %s47_s16, [#allocation5], %s316_s9, %s316_s9, %s317_s10  }
   0xa   :  { %311 = dma.done.wait [#allocation3], 128  }
   0xb   :  { %312 = vsyncadd [#allocation3], 4294967168 }
   0xc   :  { %313 = dma.done.wait [#allocation5], 768  }
   0xd   :  { %314 = vsyncadd [#allocation5], 4294966528  ;;  %v74_v0 = vld [vmem:[#allocation4 + $0x8] sm:$0xff]  ;;  %v73_v1 = vld [vmem:[#allocation4] sm:$0xff]  ;;  %vm76_vm0 = vcmask 130048   ;;  %vm106_vm1 = vcmask 261120  }
   0xe   :  { %94 = vmatpush.msra.mxu0 %v74_v0  ;;  %v72_v2 = vld [vmem:[#allocation2] sm:$0xff]  ;;  %v104_v3 = vld [vmem:[%s407_s2 + $0x18] sm:$0xff]  ;;  %v103_v4 = vld [vmem:[%s407_s2 + $0x10] sm:$0xff]  ;;  %vm210_vm5 = vcmask 31744  }
   0xf   :  { %122 = vmatpush.msra.mxu1 %v104_v3  ;;  %v102_v5 = vld [vmem:[%s407_s2 + $0x8] sm:$0xff]  ;;  %v101_v6 = vld [vmem:[%s407_s2] sm:$0xff]  ;;  %v134_v12 = vld [vmem:[#allocation6 + $0x18] sm:$0xff] }
  0x10   :  { %95 = vmatpush.msra.mxu0 %v73_v1  ;;  %v71_v7 = vld [vmem:[%s410_s5] sm:$0x7]  ;;  %151 = vmatpush.msra.mxu2 %v134_v12  ;;  %v133_v13 = vld [vmem:[#allocation6 + $0x10] sm:$0xff]  ;;  %v131_v15 = vld [vmem:[#allocation6] sm:$0xff] }
  0x11   :  { %218 = vmatmul.msk.f32.vlgmr.msra.gmra.mxu0 %vm76_vm0, %v72_v2  ;;  %123 = vmatpush.msra.mxu1 %v103_v4  ;;  %v75_v8 = vperm.slane %v71_v7, 0  ;;  %v132_v14 = vld [vmem:[#allocation6 + $0x8] sm:$0xff]  ;;  %v105_v16 = vperm.slane %v71_v7, 1  ;;  %v163_v20 = vld [vmem:[%s409_s4 + $0x18] sm:$0xff]  ;;  %v162_v21 = vld [vmem:[%s409_s4 + $0x10] sm:$0xff]  ;;  %v135_v24 = vperm.slane %v71_v7, 2 }
  0x12   :  { %152 = vmatpush.msra.mxu2 %v133_v13  ;;  %183 = vmatpush.msra.mxu3 %v163_v20  ;;  %v161_v22 = vld [vmem:[%s409_s4 + $0x8] sm:$0xff]  ;;  %v160_v23 = vld [vmem:[%s409_s4] sm:$0xff] }
  0x13   :  { %124 = vmatpush.msra.mxu1 %v102_v5  ;;  %v228_v28 = vld [vmem:[%s411_s6] ss:$0 sm:$0xff] }
  0x14   :  { %153 = vmatpush.msra.mxu2 %v132_v14  ;;  %184 = vmatpush.msra.mxu3 %v162_v21 }
  0x15   :  { %125 = vmatpush.msra.mxu1 %v101_v6 }
  0x16   :  { %154 = vmatpush.msra.mxu2 %v131_v15  ;;  %185 = vmatpush.msra.mxu3 %v161_v22 }
  0x18   :  { %186 = vmatpush.msra.mxu3 %v160_v23 }
  0x8e   :  { %v97_v9 = vpop.f32.mrf.mxu0 }
  0x8f   :  { %v98_v10 = vadd.f32 %v97_v9, %v75_v8 }
  0x91   :  { %229 = vtanh.f32 %v98_v10 }
  0x97   :  { %v230_v11 = vpop.eup %229 }
  0x98   :  { %219 = vmatmul.msk.f32.vlgmr.msra.gmra.mxu1 %vm106_vm1, %v230_v11 }
 0x115   :  { %v127_v17 = vpop.f32.mrf.mxu1 }
 0x116   :  { %v128_v18 = vadd.f32 %v127_v17, %v105_v16 }
 0x118   :  { %231 = vtanh.f32 %v128_v18 }
 0x11e   :  { %v232_v19 = vpop.eup %231 }
 0x11f   :  { %220 = vmatmul.msk.f32.vlgmr.msra.gmra.mxu2 %vm106_vm1, %v232_v19 }
 0x1a2   :  { %v156_v25 = vpop.f32.mrf.mxu2 }
 0x1a3   :  { %v157_v26 = vadd.f32 %v156_v25, %v135_v24 }
 0x1a5   :  { %233 = vtanh.f32 %v157_v26 }
 0x1ab   :  { %v234_v27 = vpop.eup %233 }
 0x1ac   :  { %221 = vmatmul.msk.f32.vlgmr.msra.gmra.mxu3 %vm106_vm1, %v234_v27 }
 0x22f   :  { %v188_v29 = vpop.f32.mrf.mxu3 }
 0x230   :  { %v189_v30 = vadd.f32 %v228_v28, %v188_v29 }
 0x232   :  { %v222_v31 = vmul.f32 -1.442695, %v189_v30 }
 0x234   :  { %235 = vpow2.f32 %v222_v31 }
 0x23a   :  { %v236_v32 = vpop.eup %235 }
 0x23b   :  { %v194_v33 = vadd.f32 1.0, %v236_v32 }
 0x23d   :  { %237 = vrcp.f32 %v194_v33  ;;  %v206_v37 = vand.u32 2147483648, %v194_v33  ;;  %v204_v39 = vand.u32 2147483647, %v194_v33  ;;  %vm200_vm3 = vweird.f32 %v194_v33 }
 0x23f   :  { %v207_v41 = vor.u32 1.1754944e-38, %v206_v37  ;;  %vm205_vm6 = vcmp.eq.f32.partialorder %v204_v39, 8.507059e+37 }
 0x243   :  { %v238_v34 = vpop.eup %237 }
 0x244   :  { %v196_v35 = vmul.f32 %v238_v34, %v194_v33  ;;  %vm201_vm2 = vweird.f32 %v238_v34 }
 0x245   :  { %vm202_vm4 = vmor %vm200_vm3, %vm201_vm2 }
 0x246   :  { %v197_v36 = vsub.f32 1.0, %v196_v35 }
 0x248   :  { %v198_v38 = vmul.f32 %v238_v34, %v197_v36 }
 0x24a   :  { %v199_v40 = vadd.f32 %v238_v34, %v198_v38 }
 0x24c   :  { %v203_v42 = vsel %vm202_vm4, %v238_v34, %v199_v40 }
 0x24d   :  { %v208_v43 = vsel %vm205_vm6, %v207_v41, %v203_v42 }
 0x24e   :  { %211 = vst.msk [vmem:[%s412_s7] sm:$0xff] %vm210_vm5, %v208_v43 }
 0x24f   :  { %216 = vsyncpa [#allocation3], 1 }
 0x250   :  { %217 = vsyncpa [#allocation5], 1 }

</bundles_post_ra>
